<compile_context>
chip_gen: v5e
topology: v5e:2x2
jax: 0.10.0
libtpu: 0.0.40
codegen_flags: <defaults>
</compile_context>

<pallas_src>
import functools

import jax
import jax.numpy as jnp
from jax.experimental import pallas as pl
from jax.experimental.pallas import tpu as pltpu

_LANES = 128     # vreg lane width
_C_GROUP = 64    # channel rows accumulated in registers at a time (bounds vregs)


def _pool_kernel(x_ref, pmax_ref, psum_ref, *, total_s, c_group):
    """Accumulate per-channel running max / running sum over spatial tiles.

    x_ref:    (1, C, tS)  one batch element, one spatial tile (tS multiple of 128)
    pmax_ref: (1, C, 128) output-resident running max (lane partials)
    psum_ref: (1, C, 128) output-resident running sum (lane partials)
    """
    k = pl.program_id(1)
    num_k = pl.num_programs(1)
    _, C, ts = x_ref.shape
    n_chunks = ts // _LANES
    last_partial = (total_s % ts) != 0   # static: a ragged last tile can exist

    @pl.when(k == 0)
    def _():
        pmax_ref[...] = jnp.full_like(pmax_ref, -jnp.inf)
        psum_ref[...] = jnp.zeros_like(psum_ref)

    def accumulate(n_full, rem):
        """Register-accumulate `n_full` unmasked 128-lane chunks plus an optional
        `rem`-lane select-masked tail chunk, then fold ONCE into the resident
        output partials.  `n_full` / `rem` are static Python ints."""
        for c0 in range(0, C, c_group):
            cg = min(c_group, C - c0)

            def body(c, carry):
                acc_max, acc_sum = carry
                off = c * _LANES
                if not isinstance(off, int):
                    off = pl.multiple_of(off, _LANES)
                chunk = x_ref[0, c0:c0 + cg, pl.ds(off, _LANES)].astype(jnp.float32)
                return jnp.maximum(acc_max, chunk), acc_sum + chunk

            init = (jnp.full((cg, _LANES), -jnp.inf, jnp.float32),
                    jnp.zeros((cg, _LANES), jnp.float32))

            if n_full == 0:
                acc_max, acc_sum = init
            elif n_full <= 8:
                acc_max, acc_sum = init
                for c in range(n_full):
                    acc_max, acc_sum = body(c, (acc_max, acc_sum))
            else:
                acc_max, acc_sum = jax.lax.fori_loop(
                    0, n_full, body, init, unroll=4)

            if rem:
                # Single partially-valid chunk on the last spatial tile.
                # Select-based masking only (OOB garbage must not propagate).
                off = n_full * _LANES
                chunk = x_ref[0, c0:c0 + cg, pl.ds(off, _LANES)].astype(jnp.float32)
                lane = jax.lax.broadcasted_iota(jnp.int32, (cg, _LANES), 1)
                valid = lane < rem
                acc_max = jnp.maximum(acc_max, jnp.where(valid, chunk, -jnp.inf))
                acc_sum = acc_sum + jnp.where(valid, chunk, 0.0)

            # One read-modify-write of the resident partials per tile & group.
            pmax_ref[0, c0:c0 + cg, :] = jnp.maximum(pmax_ref[0, c0:c0 + cg, :],
                                                     acc_max)
            psum_ref[0, c0:c0 + cg, :] = psum_ref[0, c0:c0 + cg, :] + acc_sum

    if last_partial:
        valid_last = total_s % ts            # static, in [1, ts)
        is_last = k == num_k - 1

        @pl.when(jnp.logical_not(is_last))
        def _():
            accumulate(n_chunks, 0)          # fast path: no masking at all

        @pl.when(is_last)
        def _():
            accumulate(valid_last // _LANES, valid_last % _LANES)
    else:
        accumulate(n_chunks, 0)


def _vmem_capacity_bytes():
    try:
        cap = getattr(pltpu.get_tpu_info(), "vmem_capacity_bytes", None)
        if cap:
            return int(cap)
    except Exception:
        pass
    return 64 << 20   # conservative fallback (v7x per-TensorCore VMEM)


def _pick_spatial_tile(C, S, itemsize, vmem_cap):
    """Multiple of 128, sized so a double-buffered input block uses a
    generation-appropriate slice of VMEM."""
    if vmem_cap <= (64 << 20):        # v7x-class: small VMEM, very fast HBM
        target_bytes, max_ts = 8 << 20, 65536
    else:                             # v5e / v6e: 128 MiB VMEM
        target_bytes, max_ts = 4 << 20, 32768
    ts = (target_bytes // max(1, C * itemsize)) // _LANES * _LANES
    ts = max(_LANES, min(ts, max_ts))
    if S >= _LANES:
        ts = min(ts, (S // _LANES) * _LANES)   # keep block within array extent
    return int(ts)


def channel_attention(x, w1, w2, *, ts=None):
    """x: (B, C, D, H, W); w1: (C//r, C); w2: (C, C//r). Returns (B, C, 1, 1, 1)."""
    B, C, D, H, W = x.shape
    S = D * H * W
    xf = x.reshape(B, C, S)

    # Tiny-spatial fallback: pad the flattened spatial dim up to one lane group
    # (kernel masks with total_s = true S, so padding never contributes).
    if S < _LANES:
        xf = jnp.pad(xf, ((0, 0), (0, 0), (0, _LANES - S)))
        s_arr = _LANES
    else:
        s_arr = S

    vmem_cap = _vmem_capacity_bytes()
    if ts is None:
        ts = _pick_spatial_tile(C, S, x.dtype.itemsize, vmem_cap)
        ts = min(ts, s_arr)
    assert ts % _LANES == 0 and ts <= s_arr
    num_k = pl.cdiv(s_arr, ts)

    block_bytes = C * ts * x.dtype.itemsize
    out_bytes = 2 * (C * _LANES * 4)
    needed = 2 * block_bytes + 2 * out_bytes + (1 << 20)   # double-buffered input + outs
    want = 3 * block_bytes + 4 * out_bytes + (2 << 20)
    vmem_limit = int(max(needed, min(want, int(vmem_cap * 0.75))))

    cost = pl.CostEstimate(
        flops=2 * B * C * S,  # one compare + one add per element
        transcendentals=0,
        bytes_accessed=B * C * S * x.dtype.itemsize + 2 * B * C * _LANES * 4,
    )

    pmax, psum = pl.pallas_call(
        functools.partial(_pool_kernel, total_s=S, c_group=min(_C_GROUP, C)),
        out_shape=(
            jax.ShapeDtypeStruct((B, C, _LANES), jnp.float32),
            jax.ShapeDtypeStruct((B, C, _LANES), jnp.float32),
        ),
        grid_spec=pltpu.PrefetchScalarGridSpec(
            num_scalar_prefetch=0,
            grid=(B, num_k),
            in_specs=[pl.BlockSpec((1, C, ts), lambda b, k: (b, 0, k))],
            out_specs=[
                pl.BlockSpec((1, C, _LANES), lambda b, k: (b, 0, 0)),
                pl.BlockSpec((1, C, _LANES), lambda b, k: (b, 0, 0)),
            ],
        ),
        compiler_params=pltpu.CompilerParams(
            dimension_semantics=("parallel", "arbitrary"),
            vmem_limit_bytes=vmem_limit,
        ),
        cost_estimate=cost,
    )(xf)

    # Hoisted epilogue: final cross-lane reduce + SE (1x1x1 convs are channel
    # matmuls) + sigmoid as one well-shaped batched XLA matmul over all B.
    mx = jnp.max(pmax, axis=-1)                    # (B, C)
    av = jnp.sum(psum, axis=-1) / jnp.float32(S)   # (B, C), true-S divisor

    w1f = w1.astype(jnp.float32)
    w2f = w2.astype(jnp.float32)

    def se(v):                                     # v: (B, C)
        h = jnp.maximum(v @ w1f.T, 0.0)            # (B, Cr)
        return h @ w2f.T                           # (B, C)

    out = jax.nn.sigmoid(se(mx) + se(av))
    return out.reshape(B, C, 1, 1, 1).astype(x.dtype)


def reference(x, w1, w2):
    # Pure-JAX reference of the PyTorch forward.
    mx = jnp.max(x, axis=(2, 3, 4))    # (B, C)
    av = jnp.mean(x, axis=(2, 3, 4))   # (B, C)

    def se(v):
        h = jnp.maximum(v @ w1.T, 0.0)
        return h @ w2.T

    return jax.nn.sigmoid(se(mx) + se(av)).reshape(x.shape[0], x.shape[1], 1, 1, 1)


if __name__ == "__main__":
    key = jax.random.PRNGKey(0)
    kx, k1, k2, kx2, kx3, k3, k4 = jax.random.split(key, 7)

    # Shapes consistent with the module: channel=32, reduction=16 -> hidden=2
    B, C, D, H, W = 2, 32, 4, 8, 8
    Cr = C // 16
    x = jax.random.normal(kx, (B, C, D, H, W), dtype=jnp.float32)
    w1 = jax.random.normal(k1, (Cr, C), dtype=jnp.float32) * 0.1   # Conv3d(C,Cr,1) weight
    w2 = jax.random.normal(k2, (C, Cr), dtype=jnp.float32) * 0.1   # Conv3d(Cr,C,1) weight

    # 1) Multi-tile path: ts=128 -> grid (B, 2), exercises register accumulation
    #    + once-per-tile fold, no tail masking.
    out = jax.block_until_ready(channel_attention(x, w1, w2, ts=128))
    ref = reference(x, w1, w2)
    assert out.shape == (B, C, 1, 1, 1)
    assert jnp.allclose(out, ref, atol=1e-5, rtol=1e-5)

    # 2) Ragged-tail path: S = 3*7*9 = 189 -> masked partial chunk on last tile only.
    x2 = jax.random.normal(kx2, (B, C, 3, 7, 9), dtype=jnp.float32)
    out2 = jax.block_until_ready(channel_attention(x2, w1, w2))
    ref2 = reference(x2, w1, w2)
    assert jnp.allclose(out2, ref2, atol=1e-5, rtol=1e-5)

    # 3) Large-C + tiny-spatial path: C=256 -> 4 channel groups; S=64 < 128 ->
    #    padded lane group with select masking.
    C3, Cr3 = 256, 256 // 16
    x3 = jax.random.normal(kx3, (1, C3, 2, 4, 8), dtype=jnp.float32)
    w13 = jax.random.normal(k3, (Cr3, C3), dtype=jnp.float32) * 0.05
    w23 = jax.random.normal(k4, (C3, Cr3), dtype=jnp.float32) * 0.05
    out3 = jax.block_until_ready(channel_attention(x3, w13, w23))
    ref3 = reference(x3, w13, w23)
    assert jnp.allclose(out3, ref3, atol=1e-5, rtol=1e-5)

    print("KERNEL_OK")
</pallas_src>

<mosaic_0001>
module attributes {stable_mosaic.version = 11 : i64} {
  func.func @_pool_kernel(%arg0: i32, %arg1: i32, %arg2: memref<1x32x128xf32, #tpu.memory_space<vmem>>, %arg3: memref<1x32x128xf32, #tpu.memory_space<vmem>>, %arg4: memref<1x32x128xf32, #tpu.memory_space<vmem>>) attributes {dimension_semantics = [#tpu.dimension_semantics<parallel>, #tpu.dimension_semantics<arbitrary>], iteration_bounds = array<i64: 2, 2>, scalar_prefetch = 0 : i64, scratch_operands = 0 : i64, tpu.core_type = #tpu.core_type<tc>, window_params = [{transform_indices = @transform_0, window_bounds = array<i64: 1, 32, 128>}, {transform_indices = @transform_1, window_bounds = array<i64: 1, 32, 128>}, {transform_indices = @transform_2, window_bounds = array<i64: 1, 32, 128>}]} {
    %c0_i32 = arith.constant 0 : i32
    %0 = arith.cmpi eq, %arg1, %c0_i32 : i32
    %1 = arith.extui %0 : i1 to i32
    %c0_i32_0 = arith.constant 0 : i32
    %2 = arith.cmpi ne, %1, %c0_i32_0 : i32
    scf.if %2 {
      %cst_16 = arith.constant 0xFF800000 : f32
      %21 = vector.broadcast %cst_16 : f32 to vector<1x32x128xf32>
      %c0_17 = arith.constant 0 : index
      %c0_18 = arith.constant 0 : index
      %c0_19 = arith.constant 0 : index
      %22 = vector.load %arg3[%c0_17, %c0_18, %c0_19] : memref<1x32x128xf32, #tpu.memory_space<vmem>>, vector<1x32x128xf32>
      tpu.vector_store %arg3[%c0_17, %c0_18, %c0_19], %21 {strides = array<i32>} : memref<1x32x128xf32, #tpu.memory_space<vmem>>, vector<1x32x128xf32>,
      %cst_20 = arith.constant 0.000000e+00 : f32
      %23 = vector.broadcast %cst_20 : f32 to vector<1x32x128xf32>
      %c0_21 = arith.constant 0 : index
      %c0_22 = arith.constant 0 : index
      %c0_23 = arith.constant 0 : index
      %24 = vector.load %arg4[%c0_21, %c0_22, %c0_23] : memref<1x32x128xf32, #tpu.memory_space<vmem>>, vector<1x32x128xf32>
      tpu.vector_store %arg4[%c0_21, %c0_22, %c0_23], %23 {strides = array<i32>} : memref<1x32x128xf32, #tpu.memory_space<vmem>>, vector<1x32x128xf32>,
    } else {
    }
    %cst = arith.constant 0xFF800000 : f32
    %3 = vector.broadcast %cst : f32 to vector<32x128xf32>
    %cst_1 = arith.constant 0.000000e+00 : f32
    %4 = vector.broadcast %cst_1 : f32 to vector<32x128xf32>
    %c0 = arith.constant 0 : index
    %c0_2 = arith.constant 0 : index
    %c0_3 = arith.constant 0 : index
    %5 = vector.load %arg2[%c0, %c0_2, %c0_3] : memref<1x32x128xf32, #tpu.memory_space<vmem>>, vector<1x32x128xf32>
    %6 = vector.shape_cast %5 : vector<1x32x128xf32> to vector<32x128xf32>
    %7 = arith.maximumf %3, %6 : vector<32x128xf32>
    %8 = arith.addf %4, %6 : vector<32x128xf32>
    %c0_4 = arith.constant 0 : index
    %c0_5 = arith.constant 0 : index
    %c0_6 = arith.constant 0 : index
    %9 = vector.load %arg3[%c0_4, %c0_5, %c0_6] : memref<1x32x128xf32, #tpu.memory_space<vmem>>, vector<1x32x128xf32>
    %10 = vector.shape_cast %9 : vector<1x32x128xf32> to vector<32x128xf32>
    %11 = arith.maximumf %10, %7 : vector<32x128xf32>
    %c0_7 = arith.constant 0 : index
    %c0_8 = arith.constant 0 : index
    %c0_9 = arith.constant 0 : index
    %12 = vector.load %arg3[%c0_7, %c0_8, %c0_9] : memref<1x32x128xf32, #tpu.memory_space<vmem>>, vector<1x32x128xf32>
    %13 = vector.shape_cast %12 : vector<1x32x128xf32> to vector<32x128xf32>
    %14 = vector.shape_cast %11 : vector<32x128xf32> to vector<1x32x128xf32>
    tpu.vector_store %arg3[%c0_7, %c0_8, %c0_9], %14 {strides = array<i32>} : memref<1x32x128xf32, #tpu.memory_space<vmem>>, vector<1x32x128xf32>,
    %c0_10 = arith.constant 0 : index
    %c0_11 = arith.constant 0 : index
    %c0_12 = arith.constant 0 : index
    %15 = vector.load %arg4[%c0_10, %c0_11, %c0_12] : memref<1x32x128xf32, #tpu.memory_space<vmem>>, vector<1x32x128xf32>
    %16 = vector.shape_cast %15 : vector<1x32x128xf32> to vector<32x128xf32>
    %17 = arith.addf %16, %8 : vector<32x128xf32>
    %c0_13 = arith.constant 0 : index
    %c0_14 = arith.constant 0 : index
    %c0_15 = arith.constant 0 : index
    %18 = vector.load %arg4[%c0_13, %c0_14, %c0_15] : memref<1x32x128xf32, #tpu.memory_space<vmem>>, vector<1x32x128xf32>
    %19 = vector.shape_cast %18 : vector<1x32x128xf32> to vector<32x128xf32>
    %20 = vector.shape_cast %17 : vector<32x128xf32> to vector<1x32x128xf32>
    tpu.vector_store %arg4[%c0_13, %c0_14, %c0_15], %20 {strides = array<i32>} : memref<1x32x128xf32, #tpu.memory_space<vmem>>, vector<1x32x128xf32>,
    return
  }
  func.func @transform_0(%arg0: i32, %arg1: i32) -> (i32, i32, i32) {
    %c0_i32 = arith.constant 0 : i32
    %c0_i32_0 = arith.constant 0 : i32
    return %arg0, %c0_i32, %arg1 : i32, i32, i32
  }
  func.func @transform_1(%arg0: i32, %arg1: i32) -> (i32, i32, i32) {
    %c0_i32 = arith.constant 0 : i32
    %c0_i32_0 = arith.constant 0 : i32
    %c0_i32_1 = arith.constant 0 : i32
    return %arg0, %c0_i32, %c0_i32_0 : i32, i32, i32
  }
  func.func @transform_2(%arg0: i32, %arg1: i32) -> (i32, i32, i32) {
    %c0_i32 = arith.constant 0 : i32
    %c0_i32_0 = arith.constant 0 : i32
    %c0_i32_1 = arith.constant 0 : i32
    return %arg0, %c0_i32, %c0_i32_0 : i32, i32, i32
  }
}

</mosaic_0001>

<bundles_post_ra>
// kernel: tpu_custom_call.1
= control target key start
LH: loop header
LB: loop body
LE: loop exit
PB: predicated region body
PF: predicated region fallthrough
CT: control target
= control target key end

     0   :  { %8 = vsyncpa [#allocation3], 0  ;;  %s966_s0 = inlined_call_operand.hbm [shape: f32[2,32,256], index: 0, kind: input, shape index: {}]   ;;  %s967_s1 = inlined_call_operand.hbm [shape: f32[2,32,128], index: 1, kind: output, shape index: {0}]   ;;  %s968_s2 = inlined_call_operand.hbm [shape: f32[2,32,128], index: 2, kind: output, shape index: {1}]  }
   0x1   :  { %10 = vsyncpa [#allocation3 + $0x1], 0 }
   0x2   :  { %11 = vsyncpa [#allocation4], 0 }
   0x3   :  { %13 = vsyncpa [#allocation4 + $0x1], 0 }
   0x4   :  { %14 = vsyncpa [#allocation7], 0 }
   0x5   :  { %16 = vsyncpa [#allocation7 + $0x1], 0  ;;  %s735_s9 = smov 0   ;;  %s737_s10 = smov 0  }
   0x6   :  { %s739_s11 = smov 0   ;;  %s741_s12 = smov 0  }
   0x7   :  { %s743_s13 = smov 0   ;;  %s745_s14 = smov 0  }
   0x8   :  { %s747_s15 = smov 0   ;;  %s749_s16 = smov 0  }
   0x9   :  { %s751_s17 = smov 0   ;;  %s753_s18 = smov 0  }
   0xa   :  { %s755_s19 = smov 0  }
   0xb LB: > { %972 = sst [smem:[#allocation11_spill]] %s691_s14  ;;  %s391_s20 = sadd.s32 4294967295, %s711_s19   ;;  %s711_s19 = sphi %s755_s19, %s22_s19   ;;  %s707_s18 = sphi %s753_s18, %s994_s18   ;;  %s703_s17 = sphi %s751_s17, %s993_s17   ;;  %s699_s16 = sphi %s749_s16, %s992_s16   ;;  %s695_s15 = sphi %s747_s15, %s991_s15   ;;  %s691_s14 = sphi %s745_s14, %s983_s14   ;;  %s687_s13 = sphi %s743_s13, %s990_s13   ;;  %s683_s12 = sphi %s741_s12, %s989_s12   ;;  %s679_s11 = sphi %s739_s11, %s988_s11   ;;  %s675_s10 = sphi %s737_s10, %s987_s10   ;;  %s671_s9 = sphi %s735_s9, %s986_s9  }
   0xc   : > { %s392_s21 = sadd.s32 4294967294, %s711_s19   ;;  %s31_s22 = sadd.s32 1, %s703_s17 }
   0xd   : > { %s34_s23 = sadd.s32 1, %s707_s18  ;;  %p32_p0 = scmp.ge.s32.totalorder %s31_s22, 2 }
   0xe   : > { %s43_s24 = sadd.s32 1, %s691_s14  ;;  %p50_p1 = scmp.ne.s32.totalorder %s691_s14, %s687_s13 }
   0xf   : > { %p51_p2 = scmp.eq.s32.totalorder %s711_s19, 0  ;;  %s996_s22 = smov (%p32_p0, %s31_s22), 0 }
  0x10   : > { %973 = sst [smem:[#allocation12_spill]] %s996_s22  ;;  %s998_s23 = smov (!%p32_p0, %s34_s23), %s707_s18 }
  0x11   : > { %s39_s25 = ssub.s32 %s703_s17, %s996_s22  ;;  %p801_p3 = por %p51_p2, %p50_p1 }
  0x12   : > { %p36_p4 = scmp.ge.s32.totalorder %s998_s23, 2  ;;  %p56_p5 = scmp.ne.s32.totalorder %s687_s13, %s683_s12 }
  0x13   : > { %p57_p6 = scmp.eq.s32.totalorder %s391_s20, 0  ;;  %s69_s27 = sadd.s32 1, %s679_s11 }
  0x14   : > { %s1000_s23 = smov (%p36_p4, %s998_s23), 0  ;;  %p79_p8 = scmp.ne.s32.totalorder %s679_s11, %s675_s10 }
  0x15   : > { %975 = sst [smem:[#allocation13_spill]] %s1000_s23  ;;  %p809_p7 = por %p57_p6, %p56_p5 }
  0x16   : > { %s38_s29 = ssub.s32 %s707_s18, %s1000_s23  ;;  %p80_p9 = scmp.eq.s32.totalorder %s391_s20, 3 }
  0x17   : > { %s40_s30 = sor.u32 %s39_s25, %s38_s29  ;;  %p67_p10 = scmp.eq.s32.totalorder %s38_s29, 0 }
  0x18   : > { %p41_p11 = scmp.eq.s32.totalorder %s40_s30, 0  ;;  %p817_p12 = por %p80_p9, %p79_p8 }
  0x19   : > { %s822_s4 = scalar_select %p67_p10, %s679_s11, %s69_s27  }
  0x1a   : > { %s825_s5 = scalar_select %p41_p11, %s691_s14, %s43_s24  }
  0x1b   : > { %978 = sst [smem:[#allocation14_spill]] %s822_s4  ;;  %p85_p13 = scmp.ne.s32.totalorder %s675_s10, %s671_s9 }
  0x1c   : > { %979 = sst [smem:[#allocation15_spill]] %s825_s5  ;;  %p86_p0 = scmp.eq.s32.totalorder %s392_s21, 3 }
  0x1d   : > { %p430_p1 = scmp.lt.s32.totalorder %s711_s19, 4  ;;  %s132_s7 = sand.u32 1, %s691_s14  }
  0x1e   : > { %p830_p2 = por %p86_p0, %p85_p13  ;;  %s395_s8 = sshll.u32 %s132_s7, 5 }
  0x1f   : > { %s396_s12 = sshll.u32 %s707_s18, 3  ;;  %s136_s25 = scalar_lea.vmem [#allocation2], %s395_s8 }
  0x20   : > { %s140_s20 = sadd.s32 %s703_s17, %s396_s12  ;;  %s145_s29 = sshll.u32 %s136_s25, 4  ;;  %s146_s29 = int_to_ptr.vmem [resolvable:$true] %s145_s29 }
  0x21   : > { %s397_s30 = sshll.u32 %s140_s20, 3  ;;  %p420_p4 = pnand %p430_p1, %p801_p3 }
  0x22   : > { %s142_s23 = scalar_lea.hbm %s966_s0, %s397_s30  ;;  %s133_s22 = scalar_lea.sflag [#allocation3], %s132_s7 }
  0x23   : > { %s143_s21 = sshll.u32 %s142_s23, 4  ;;  %s713_s5 = smov 256   ;;  %s144_s21 = int_to_ptr.hbm [resolvable:$true] %s143_s21 }
  0x24   : > { %s714_s14 = smov 128   ;;  %s715_s4 = smov 8  }
  0x25   : > { %422 = dma.hbm_to_vmem [thread:$0]  (!%p420_p4), %s144_s21, 512, %s146_s29, %s133_s22, %s713_s5, %s714_s14, %s715_s4  }
  0x26   : > { %p398_p5 = scmp.ge.s32.totalorder %s711_s19, 1  ;;  %p153_p6 = scmp.lt.s32.totalorder %s711_s19, 5 }
  0x28   : > { %p154_p8 = pnand %p398_p5, %p153_p6 }
  0x29   : > { %s159_s8 = sand.u32 (!%p154_p8), 1, %s687_s13  }
  0x2a   : > { %157 = sbr.rel (%p154_p8) target bundleno = 94 (0x5e), region = 24  ;;  %s399_s12 = sshll.u32 (!%p154_p8), %s159_s8, 5 }
  0x2b   : > { %s160_s20 = scalar_lea.sflag (!%p154_p8), [#allocation3], %s159_s8  ;;  %s845_s25 = scalar_lea.vmem (!%p154_p8), [#allocation2], %s399_s12 }
  0x2f   : > { %658 = dma.done.wait (%p809_p7), %s160_s20, 512  }
  0x30   : > { %660 = vsyncadd (%p809_p7), %s160_s20, 4294966784  ;;  %s852_s23 = sand.u32 1, %s675_s10   ;;  %p402_p3 = scmp.ne.s32.totalorder %s695_s15, 0 }
  0x31   : > { %s400_s14 = sshll.u32 %s852_s23, 5 }
  0x32   : > { %s855_s22 = scalar_lea.vmem [#allocation5], %s400_s14  ;;  %s857_s26 = scalar_lea.vmem [#allocation6], %s400_s14 }
  0x33   : > { %193 = sbr.rel (%p402_p3) target bundleno = 65 (0x41), region = 32 }
  0x38   : > { %v716_v0 = vmov -inf   ;;  %v717_v1 = vmov 0.0  }
  0x39   : > { %194 = vst [vmem:[%s855_s22] sm:$0xff] %v716_v0 }
  0x3a   : > { %195 = vst [vmem:[%s855_s22 + $0x8] sm:$0xff] %v716_v0 }
  0x3b   : > { %196 = vst [vmem:[%s855_s22 + $0x10] sm:$0xff] %v716_v0 }
  0x3c   : > { %197 = vst [vmem:[%s855_s22 + $0x18] sm:$0xff] %v716_v0 }
  0x3d   : > { %198 = vst [vmem:[%s857_s26] sm:$0xff] %v717_v1 }
  0x3e   : > { %199 = vst [vmem:[%s857_s26 + $0x8] sm:$0xff] %v717_v1 }
  0x3f   : > { %200 = vst [vmem:[%s857_s26 + $0x10] sm:$0xff] %v717_v1 }
  0x40   : > { %201 = vst [vmem:[%s857_s26 + $0x18] sm:$0xff] %v717_v1 }
  0x41 PF: > { %v202_v2 = vld [vmem:[%s845_s25] sm:$0xff]  ;;  %v203_v4 = vld [vmem:[%s845_s25 + $0x8] sm:$0xff]  ;;  %s411_s15 = sshll.u32 %s699_s16, 5  ;;  %v204_v7 = vld [vmem:[%s845_s25 + $0x10] sm:$0xff]  ;;  %s252_s7 = sshll.u32 %s855_s22, 4  ;;  %s888_s7 = int_to_ptr.vmem [resolvable:$true] %s252_s7 }
  0x42   : > { %v210_v3 = vld [vmem:[%s855_s22] sm:$0xff]  ;;  %v211_v6 = vld [vmem:[%s855_s22 + $0x8] sm:$0xff]  ;;  %v212_v8 = vld [vmem:[%s855_s22 + $0x10] sm:$0xff]  ;;  %s251_s5 = scalar_lea.hbm %s967_s1, %s411_s15  ;;  %s268_s27 = scalar_lea.hbm %s968_s2, %s411_s15 }
  0x43   : > { %v214_v5 = vmax.f32 %v210_v3, %v202_v2  ;;  %v215_v9 = vmax.f32 %v211_v6, %v203_v4  ;;  %v216_v10 = vmax.f32 %v212_v8, %v204_v7  ;;  %v205_v11 = vld [vmem:[%s845_s25 + $0x18] sm:$0xff]  ;;  %s254_s16 = sshll.u32 %s251_s5, 4  ;;  %s269_s24 = sshll.u32 %s857_s26, 4  ;;  %s255_s16 = int_to_ptr.hbm [resolvable:$true] %s254_s16  ;;  %s898_s24 = int_to_ptr.vmem [resolvable:$true] %s269_s24 }
  0x44   : > { %v213_v12 = vld [vmem:[%s855_s22 + $0x18] sm:$0xff]  ;;  %v222_v13 = vld [vmem:[%s857_s26] sm:$0xff]  ;;  %s271_s21 = sshll.u32 %s268_s27, 4  ;;  %s235_s8 = scalar_lea.sflag [#allocation4], %s852_s23  ;;  %s900_s21 = int_to_ptr.hbm [resolvable:$true] %s271_s21 }
  0x45   : > { %218 = vst [vmem:[%s855_s22] sm:$0xff] %v214_v5  ;;  %v217_v14 = vmax.f32 %v213_v12, %v205_v11  ;;  %v226_v15 = vadd.f32 %v222_v13, %v202_v2  ;;  %v223_v16 = vld [vmem:[%s857_s26 + $0x8] sm:$0xff]  ;;  %s571_s12 = sshra.s32 %s255_s16, 4  ;;  %s572_s12 = int_to_ptr.hbm [resolvable:$true] %s571_s12 }
  0x46   : > { %v224_v17 = vld [vmem:[%s857_s26 + $0x10] sm:$0xff]  ;;  %219 = vst [vmem:[%s855_s22 + $0x8] sm:$0xff] %v215_v9  ;;  %v227_v19 = vadd.f32 %v223_v16, %v203_v4  ;;  %s573_s20 = scalar_lea.hbm %s572_s12, 32  ;;  %p578_p11 = scmp.lt.s32.totalorder %s572_s12, %s967_s1 }
  0x47   : > { %v225_v18 = vld [vmem:[%s857_s26 + $0x18] sm:$0xff]  ;;  %220 = vst [vmem:[%s855_s22 + $0x10] sm:$0xff] %v216_v10  ;;  %v228_v20 = vadd.f32 %v224_v17, %v204_v7  ;;  %p574_p7 = scmp.ne.s32.totalorder %s572_s12, %s573_s20 }
  0x48   : > { %221 = vst [vmem:[%s855_s22 + $0x18] sm:$0xff] %v217_v14  ;;  %v229_v21 = vadd.f32 %v225_v18, %v205_v11  ;;  %s577_s22 = scalar_lea.hbm %s967_s1, 64 }
  0x49   : > { %230 = vst [vmem:[%s857_s26] sm:$0xff] %v226_v15  ;;  %p575_p9 = pnand %p574_p7, %p817_p12  ;;  %p579_p13 = scmp.lt.s32.totalorder %s577_s22, %s573_s20 }
  0x4a   : > { %231 = vst [vmem:[%s857_s26 + $0x8] sm:$0xff] %v227_v19 }
  0x4b   : > { %232 = vst [vmem:[%s857_s26 + $0x10] sm:$0xff] %v228_v20  ;;  %p576_p10 = pneg %p575_p9  ;;  %p580_p0 = por %p579_p13, %p578_p11 }
  0x4c   : > { %233 = vst [vmem:[%s857_s26 + $0x18] sm:$0xff] %v229_v21 }
  0x4d   : > { %p581_p1 = pnand %p580_p0, %p576_p10 }
  0x4f   : > { %584 = shalt.err (!%p581_p1)
}
  0x50   : > { %s718_s26 = smov 128   ;;  %s719_s4 = smov 8  }
  0x51   : > { %415 = dma.vmem_to_hbm [thread:$0]  (%p817_p12), %s888_s7, 512, %s255_s16, %s235_s8, %s718_s26, %s718_s26, %s719_s4  }
  0x52   : > { %s240_s5 = scalar_lea.sflag [#allocation7], %s852_s23  ;;  %s599_s29 = sshra.s32 %s900_s21, 4  ;;  %s600_s29 = int_to_ptr.hbm [resolvable:$true] %s599_s29 }
  0x53   : > { %s601_s30 = scalar_lea.hbm %s600_s29, 32  ;;  %s605_s20 = scalar_lea.hbm %s968_s2, 64 }
  0x54   : > { %p602_p4 = scmp.ne.s32.totalorder %s600_s29, %s601_s30  ;;  %p606_p8 = scmp.lt.s32.totalorder %s600_s29, %s968_s2 }
  0x55   : > { %p607_p3 = scmp.lt.s32.totalorder %s605_s20, %s601_s30 }
  0x56   : > { %p603_p5 = pnand %p602_p4, %p817_p12 }
  0x57   : > { %p608_p7 = por %p607_p3, %p606_p8 }
  0x58   : > { %p604_p6 = pneg %p603_p5 }
  0x5a   : > { %p609_p9 = pnand %p608_p7, %p604_p6 }
  0x5c   : > { %612 = shalt.err (!%p609_p9)
}
  0x5d   : > { %416 = dma.vmem_to_hbm [thread:$0]  (%p817_p12), %s898_s24, 512, %s900_s21, %s240_s5, %s718_s26, %s718_s26, %s719_s4  }
  0x5e PF: > { %p431_p10 = scmp.ge.s32.totalorder %s711_s19, 2  ;;  %s286_s23 = sand.u32 1, %s671_s9  }
  0x5f   : > { %s287_s7 = scalar_lea.sflag [#allocation4], %s286_s23 }
  0x60   : > { %p424_p11 = pnand %p431_p10, %p830_p2 }
  0x62   : > { %p425_p13 = pneg %p424_p11 }
  0x64   : > { %662 = dma.done.wait (%p425_p13), %s287_s7, 512  }
  0x65   : > { %664 = vsyncadd (%p425_p13), %s287_s7, 4294966784  ;;  %s297_s16 = scalar_lea.sflag [#allocation7], %s286_s23 }
  0x66   : > { %666 = dma.done.wait (%p425_p13), %s297_s16, 512  }
  0x67   : > { %668 = vsyncadd (%p425_p13), %s297_s16, 4294966784  ;;  %s22_s19 = sadd.s32 1, %s711_s19   ;;  %s981_s3 = sld [smem:[#allocation14_spill]] }
  0x68   : > { %p19_p0 = scmp.ge.s32.totalorder %s22_s19, 6   ;;  %s982_s24 = sld [smem:[#allocation11_spill]] }
  0x69   : > { %s983_s14 = sld [smem:[#allocation15_spill]]  ;;  %s986_s9 = smov %s675_s10 }
  0x6a   : > { %s984_s6 = sld [smem:[#allocation12_spill]]  ;;  %s987_s10 = smov %s679_s11 }
  0x6b   : > { %s985_s21 = sld [smem:[#allocation13_spill]]  ;;  %s989_s12 = smov %s687_s13 }
  0x6c   : > { %s991_s15 = smov %s703_s17  ;;  %s992_s16 = smov %s707_s18 }
  0x6d   : > { %s988_s11 = smov %s981_s3  ;;  %21 = sbr.rel (!%p19_p0) target bundleno = 11 (0xb), region = 90 }
  0x6e   : > { %s990_s13 = smov %s982_s24 }
  0x70   : > { %s993_s17 = smov %s984_s6 }
  0x71   : > { %s994_s18 = smov %s985_s21 }
  0x72   :  { %303 = vsyncpa [#allocation3], 1 }
  0x73   :  { %305 = vsyncpa [#allocation3 + $0x1], 1 }
  0x74   :  { %306 = vsyncpa [#allocation4], 1 }
  0x75   :  { %308 = vsyncpa [#allocation4 + $0x1], 1 }
  0x76   :  { %309 = vsyncpa [#allocation7], 1 }
  0x77   :  { %311 = vsyncpa [#allocation7 + $0x1], 1 }

</bundles_post_ra>
